<compile_context>
chip_gen: v5e
topology: v5e:2x2
jax: 0.10.0
libtpu: 0.0.40
codegen_flags: <defaults>
</compile_context>

<pallas_src>
import numpy as np
import jax
import jax.numpy as jnp
from jax.experimental import pallas as pl
from jax.experimental.pallas import tpu as pltpu

NEG_INF = -1e30  # finite "minus infinity" for masked softmax lanes


def policy_head_kernel(cw_ref, shift_ref, x_ref, lw_ref, lb_ref, o_ref):
    """Fused 1x1 conv + BN(shift) + ReLU + Linear + Softmax for one batch tile.

    cw_ref    : (C_out, C_in)       f32 SMEM  conv weights, BN scale folded in
    shift_ref : (1, C_out*hw_k)     f32 VMEM  folded BN shift, channel-broadcast
    x_ref     : (TB, C_in*hw_k)     f32 VMEM  input tile, channel slices 128-aligned
    lw_ref    : (C_out*hw_k, HW_pad)f32 VMEM  linear weight slab (zero pad rows/cols)
    lb_ref    : (1, HW_pad)         f32 VMEM  linear bias (pad lanes = -1e30)
    o_ref     : (TB, HW_pad)        f32 VMEM  softmax(priors), lane-dense padded
    """
    c_out, c_in = cw_ref.shape
    kdim = shift_ref.shape[-1]
    hw_k = kdim // c_out

    # 1x1 conv (BN scale already folded into cw): per output channel a small
    # VPU linear combination over 128-aligned lane slices of the flat input.
    # Only C_out*C_in (= 32) scalar coefficients -> negligible next to the MXU dot.
    acts = []
    for o in range(c_out):
        conv_o = cw_ref[o, 0] * x_ref[:, 0:hw_k]
        for ci in range(1, c_in):
            conv_o = conv_o + cw_ref[o, ci] * x_ref[:, ci * hw_k:(ci + 1) * hw_k]
        acts.append(conv_o)

    # Channel-major concat at 128-lane boundaries (pure vreg assembly, no
    # shuffles); matches the padded row order of lw_ref.
    act = jnp.concatenate(acts, axis=-1)                  # (TB, C_out*hw_k)
    # BN shift + ReLU fused into one vector pass over the full-width tensor.
    act = jnp.maximum(act + shift_ref[...], 0.0)

    # Single fused MXU matmul over K = C_out*hw_k against the resident slab.
    logits = jnp.dot(act, lw_ref[...], preferred_element_type=jnp.float32)
    logits = logits + lb_ref[...]  # pad lanes carry -1e30 bias -> exp ~ 0

    # Numerically-stable softmax over the padded (lane-dense) width.
    m = jnp.max(logits, axis=-1, keepdims=True)
    e = jnp.exp(logits - m)
    denom = jnp.sum(e, axis=-1, keepdims=True)
    o_ref[...] = (e * pl.reciprocal(denom, approx=False)).astype(o_ref.dtype)


def policy_head(x, params, eps=1e-5, batch_tile=128):
    """x: (N, C_in, H, W) float32  ->  (N, H*W) softmax priors."""
    N, c_in, H, W = x.shape
    hw = H * W
    c_out = params["conv_w"].shape[0]  # = 4

    # ---- wrapper-side (one-time) parameter prep -------------------------------
    # Fold BN running stats (inference semantics) into the conv weights and a
    # per-channel shift.
    scale = params["bn_gamma"] / jnp.sqrt(params["bn_var"] + eps)   # (C_out,)
    shift = params["bn_beta"] - params["bn_mean"] * scale           # (C_out,)
    cw_folded = (params["conv_w"] * scale[:, None]).astype(jnp.float32)

    # Per-channel spatial width padded to a 128-lane multiple so every channel
    # slice / concat boundary is vreg-aligned.
    hw_k = max(128, ((hw + 127) // 128) * 128)     # padded K per channel
    hw_pad = max(128, ((hw + 127) // 128) * 128)   # padded output width
    kdim = c_out * hw_k

    # BN shift as a (1, K) row: shift[o] broadcast over that channel's lanes.
    shift_row = jnp.repeat(shift.astype(jnp.float32), hw_k).reshape(1, kdim)

    # Linear weight -> (K, HW_pad) slab in padded channel-major row order.
    # lin_w is (HW, C_out*HW) with column index c*HW + p; its transpose rows
    # (c*HW + p) are re-laid-out to rows (c*hw_k + p); pad rows/cols are zero.
    lwT = params["lin_w"].T.astype(jnp.float32).reshape(c_out, hw, hw)
    lwT = jnp.pad(lwT, ((0, 0), (0, hw_k - hw), (0, hw_pad - hw)))
    lw_slab = lwT.reshape(kdim, hw_pad)                             # (K, HW_pad)

    lb = jnp.full((1, hw_pad), NEG_INF, jnp.float32)
    lb = lb.at[0, :hw].set(params["lin_b"].astype(jnp.float32))     # (1, HW_pad)

    # ---- batch tiling (>= 8 sublanes per tile; pad batch to tile multiple) ----
    tb = int(batch_tile)
    if N < tb:
        tb = max(8, -(-N // 8) * 8)
    n_pad = -(-N // tb) * tb

    # Lane-dense input slab: (N_pad, C_in*hw_k); channel slices 128-aligned,
    # spatial pad positions are zero (they hit zero weight rows -> no effect).
    x_flat = x.reshape(N, c_in, hw).astype(jnp.float32)
    x_flat = jnp.pad(x_flat, ((0, n_pad - N), (0, 0), (0, hw_k - hw)))
    x_flat = x_flat.reshape(n_pad, c_in * hw_k)

    grid = (n_pad // tb,)

    out = pl.pallas_call(
        policy_head_kernel,
        out_shape=jax.ShapeDtypeStruct((n_pad, hw_pad), jnp.float32),
        grid=grid,
        in_specs=[
            # Tiny conv-weight table: whole array resident in SMEM (scalars).
            pl.BlockSpec(memory_space=pltpu.MemorySpace.SMEM),            # cw_folded
            # Small vector params mapped to block (0,0) -> VMEM-resident.
            pl.BlockSpec((1, kdim), lambda i: (0, 0)),                    # shift row
            # Batch-tiled, lane-dense input; auto double-buffered over grid.
            pl.BlockSpec((tb, c_in * hw_k), lambda i: (i, 0)),            # x tile
            pl.BlockSpec((kdim, hw_pad), lambda i: (0, 0)),               # linear W
            pl.BlockSpec((1, hw_pad), lambda i: (0, 0)),                  # linear b
        ],
        out_specs=pl.BlockSpec((tb, hw_pad), lambda i: (i, 0)),
        compiler_params=pltpu.CompilerParams(
            dimension_semantics=("parallel",)),
    )(cw_folded, shift_row, x_flat, lw_slab, lb)

    # Drop batch padding and the lane padding of the softmax width.
    return out[:N, :hw]


def reference(x, params, eps=1e-5):
    """Pure-JAX reference of the PyTorch forward (eval-mode BN)."""
    N = x.shape[0]
    conv = jnp.einsum("oc,nchw->nohw", params["conv_w"], x)
    scale = params["bn_gamma"] / jnp.sqrt(params["bn_var"] + eps)
    shift = params["bn_beta"] - params["bn_mean"] * scale
    act = jnp.maximum(conv * scale[None, :, None, None]
                      + shift[None, :, None, None], 0.0)
    flat = act.reshape(N, -1)                     # NCHW channel-major flatten
    logits = flat @ params["lin_w"].T + params["lin_b"]
    return jax.nn.softmax(logits, axis=-1)


def make_params(key, in_channels, board_size):
    hw = board_size * board_size
    ks = jax.random.split(key, 6)
    return {
        # nn.Conv2d(in_channels, 4, kernel_size=1, bias=False) -> (4, C_in)
        "conv_w": jax.random.normal(ks[0], (4, in_channels), jnp.float32) * 0.2,
        # nn.BatchNorm2d(4) parameters / running stats (deterministic, non-trivial)
        "bn_gamma": 1.0 + 0.1 * jax.random.normal(ks[1], (4,), jnp.float32),
        "bn_beta": 0.1 * jax.random.normal(ks[2], (4,), jnp.float32),
        "bn_mean": 0.1 * jax.random.normal(ks[3], (4,), jnp.float32),
        "bn_var": jnp.abs(jax.random.normal(ks[4], (4,), jnp.float32)) + 0.5,
        # nn.Linear(board_size**2 * 4, board_size**2)
        "lin_w": jax.random.normal(ks[5], (hw, 4 * hw), jnp.float32) * 0.05,
        "lin_b": jnp.linspace(-0.1, 0.1, hw, dtype=jnp.float32),
    }


if __name__ == "__main__":
    batch, in_channels, board_size = 2, 8, 8
    key = jax.random.PRNGKey(0)
    k_x, k_p = jax.random.split(key)

    x = jax.random.normal(k_x, (batch, in_channels, board_size, board_size),
                          jnp.float32)
    params = make_params(k_p, in_channels, board_size)

    out = jax.block_until_ready(policy_head(x, params))
    ref = jax.block_until_ready(reference(x, params))

    assert out.shape == (batch, board_size * board_size)
    np.testing.assert_allclose(np.asarray(out), np.asarray(ref),
                               rtol=1e-5, atol=1e-5)
    # Softmax rows sum to 1.
    np.testing.assert_allclose(np.asarray(out).sum(-1), 1.0, rtol=1e-5)
    print("KERNEL_OK")
</pallas_src>

<mosaic_0001>
module attributes {stable_mosaic.version = 11 : i64} {
  func.func @policy_head_kernel(%arg0: i32, %arg1: memref<4x8xf32, #tpu.memory_space<smem>>, %arg2: memref<1x512xf32, #tpu.memory_space<vmem>>, %arg3: memref<8x1024xf32, #tpu.memory_space<vmem>>, %arg4: memref<512x128xf32, #tpu.memory_space<vmem>>, %arg5: memref<1x128xf32, #tpu.memory_space<vmem>>, %arg6: memref<8x128xf32, #tpu.memory_space<vmem>>) attributes {dimension_semantics = [#tpu.dimension_semantics<parallel>], iteration_bounds = array<i64: 1>, scalar_prefetch = 0 : i64, scratch_operands = 0 : i64, tpu.core_type = #tpu.core_type<tc>, window_params = [{transform_indices = @transform_0, window_bounds = array<i64: 4, 8>}, {pipeline_mode = #tpu.pipeline_mode<synchronous>, transform_indices = @transform_1, window_bounds = array<i64: 1, 512>}, {transform_indices = @transform_2, window_bounds = array<i64: 8, 1024>}, {pipeline_mode = #tpu.pipeline_mode<synchronous>, transform_indices = @transform_3, window_bounds = array<i64: 512, 128>}, {pipeline_mode = #tpu.pipeline_mode<synchronous>, transform_indices = @transform_4, window_bounds = array<i64: 1, 128>}, {transform_indices = @transform_5, window_bounds = array<i64: 8, 128>}]} {
    %c0 = arith.constant 0 : index
    %c0_0 = arith.constant 0 : index
    %0 = memref.load %arg1[%c0, %c0_0] : memref<4x8xf32, #tpu.memory_space<smem>>
    %c0_1 = arith.constant 0 : index
    %c0_2 = arith.constant 0 : index
    %1 = vector.load %arg3[%c0_1, %c0_2] : memref<8x1024xf32, #tpu.memory_space<vmem>>, vector<8x128xf32>
    %2 = vector.broadcast %0 : f32 to vector<8x128xf32>
    %3 = arith.mulf %2, %1 : vector<8x128xf32>
    %c0_3 = arith.constant 0 : index
    %c1 = arith.constant 1 : index
    %4 = memref.load %arg1[%c0_3, %c1] : memref<4x8xf32, #tpu.memory_space<smem>>
    %c0_4 = arith.constant 0 : index
    %c128 = arith.constant 128 : index
    %5 = vector.load %arg3[%c0_4, %c128] : memref<8x1024xf32, #tpu.memory_space<vmem>>, vector<8x128xf32>
    %6 = vector.broadcast %4 : f32 to vector<8x128xf32>
    %7 = arith.mulf %6, %5 : vector<8x128xf32>
    %8 = arith.addf %3, %7 : vector<8x128xf32>
    %c0_5 = arith.constant 0 : index
    %c2 = arith.constant 2 : index
    %9 = memref.load %arg1[%c0_5, %c2] : memref<4x8xf32, #tpu.memory_space<smem>>
    %c0_6 = arith.constant 0 : index
    %c256 = arith.constant 256 : index
    %10 = vector.load %arg3[%c0_6, %c256] : memref<8x1024xf32, #tpu.memory_space<vmem>>, vector<8x128xf32>
    %11 = vector.broadcast %9 : f32 to vector<8x128xf32>
    %12 = arith.mulf %11, %10 : vector<8x128xf32>
    %13 = arith.addf %8, %12 : vector<8x128xf32>
    %c0_7 = arith.constant 0 : index
    %c3 = arith.constant 3 : index
    %14 = memref.load %arg1[%c0_7, %c3] : memref<4x8xf32, #tpu.memory_space<smem>>
    %c0_8 = arith.constant 0 : index
    %c384 = arith.constant 384 : index
    %15 = vector.load %arg3[%c0_8, %c384] : memref<8x1024xf32, #tpu.memory_space<vmem>>, vector<8x128xf32>
    %16 = vector.broadcast %14 : f32 to vector<8x128xf32>
    %17 = arith.mulf %16, %15 : vector<8x128xf32>
    %18 = arith.addf %13, %17 : vector<8x128xf32>
    %c0_9 = arith.constant 0 : index
    %c4 = arith.constant 4 : index
    %19 = memref.load %arg1[%c0_9, %c4] : memref<4x8xf32, #tpu.memory_space<smem>>
    %c0_10 = arith.constant 0 : index
    %c512 = arith.constant 512 : index
    %20 = vector.load %arg3[%c0_10, %c512] : memref<8x1024xf32, #tpu.memory_space<vmem>>, vector<8x128xf32>
    %21 = vector.broadcast %19 : f32 to vector<8x128xf32>
    %22 = arith.mulf %21, %20 : vector<8x128xf32>
    %23 = arith.addf %18, %22 : vector<8x128xf32>
    %c0_11 = arith.constant 0 : index
    %c5 = arith.constant 5 : index
    %24 = memref.load %arg1[%c0_11, %c5] : memref<4x8xf32, #tpu.memory_space<smem>>
    %c0_12 = arith.constant 0 : index
    %c640 = arith.constant 640 : index
    %25 = vector.load %arg3[%c0_12, %c640] : memref<8x1024xf32, #tpu.memory_space<vmem>>, vector<8x128xf32>
    %26 = vector.broadcast %24 : f32 to vector<8x128xf32>
    %27 = arith.mulf %26, %25 : vector<8x128xf32>
    %28 = arith.addf %23, %27 : vector<8x128xf32>
    %c0_13 = arith.constant 0 : index
    %c6 = arith.constant 6 : index
    %29 = memref.load %arg1[%c0_13, %c6] : memref<4x8xf32, #tpu.memory_space<smem>>
    %c0_14 = arith.constant 0 : index
    %c768 = arith.constant 768 : index
    %30 = vector.load %arg3[%c0_14, %c768] : memref<8x1024xf32, #tpu.memory_space<vmem>>, vector<8x128xf32>
    %31 = vector.broadcast %29 : f32 to vector<8x128xf32>
    %32 = arith.mulf %31, %30 : vector<8x128xf32>
    %33 = arith.addf %28, %32 : vector<8x128xf32>
    %c0_15 = arith.constant 0 : index
    %c7 = arith.constant 7 : index
    %34 = memref.load %arg1[%c0_15, %c7] : memref<4x8xf32, #tpu.memory_space<smem>>
    %c0_16 = arith.constant 0 : index
    %c896 = arith.constant 896 : index
    %35 = vector.load %arg3[%c0_16, %c896] : memref<8x1024xf32, #tpu.memory_space<vmem>>, vector<8x128xf32>
    %36 = vector.broadcast %34 : f32 to vector<8x128xf32>
    %37 = arith.mulf %36, %35 : vector<8x128xf32>
    %38 = arith.addf %33, %37 : vector<8x128xf32>
    %c1_17 = arith.constant 1 : index
    %c0_18 = arith.constant 0 : index
    %39 = memref.load %arg1[%c1_17, %c0_18] : memref<4x8xf32, #tpu.memory_space<smem>>
    %c0_19 = arith.constant 0 : index
    %c0_20 = arith.constant 0 : index
    %40 = vector.load %arg3[%c0_19, %c0_20] : memref<8x1024xf32, #tpu.memory_space<vmem>>, vector<8x128xf32>
    %41 = vector.broadcast %39 : f32 to vector<8x128xf32>
    %42 = arith.mulf %41, %40 : vector<8x128xf32>
    %c1_21 = arith.constant 1 : index
    %c1_22 = arith.constant 1 : index
    %43 = memref.load %arg1[%c1_21, %c1_22] : memref<4x8xf32, #tpu.memory_space<smem>>
    %c0_23 = arith.constant 0 : index
    %c128_24 = arith.constant 128 : index
    %44 = vector.load %arg3[%c0_23, %c128_24] : memref<8x1024xf32, #tpu.memory_space<vmem>>, vector<8x128xf32>
    %45 = vector.broadcast %43 : f32 to vector<8x128xf32>
    %46 = arith.mulf %45, %44 : vector<8x128xf32>
    %47 = arith.addf %42, %46 : vector<8x128xf32>
    %c1_25 = arith.constant 1 : index
    %c2_26 = arith.constant 2 : index
    %48 = memref.load %arg1[%c1_25, %c2_26] : memref<4x8xf32, #tpu.memory_space<smem>>
    %c0_27 = arith.constant 0 : index
    %c256_28 = arith.constant 256 : index
    %49 = vector.load %arg3[%c0_27, %c256_28] : memref<8x1024xf32, #tpu.memory_space<vmem>>, vector<8x128xf32>
    %50 = vector.broadcast %48 : f32 to vector<8x128xf32>
    %51 = arith.mulf %50, %49 : vector<8x128xf32>
    %52 = arith.addf %47, %51 : vector<8x128xf32>
    %c1_29 = arith.constant 1 : index
    %c3_30 = arith.constant 3 : index
    %53 = memref.load %arg1[%c1_29, %c3_30] : memref<4x8xf32, #tpu.memory_space<smem>>
    %c0_31 = arith.constant 0 : index
    %c384_32 = arith.constant 384 : index
    %54 = vector.load %arg3[%c0_31, %c384_32] : memref<8x1024xf32, #tpu.memory_space<vmem>>, vector<8x128xf32>
    %55 = vector.broadcast %53 : f32 to vector<8x128xf32>
    %56 = arith.mulf %55, %54 : vector<8x128xf32>
    %57 = arith.addf %52, %56 : vector<8x128xf32>
    %c1_33 = arith.constant 1 : index
    %c4_34 = arith.constant 4 : index
    %58 = memref.load %arg1[%c1_33, %c4_34] : memref<4x8xf32, #tpu.memory_space<smem>>
    %c0_35 = arith.constant 0 : index
    %c512_36 = arith.constant 512 : index
    %59 = vector.load %arg3[%c0_35, %c512_36] : memref<8x1024xf32, #tpu.memory_space<vmem>>, vector<8x128xf32>
    %60 = vector.broadcast %58 : f32 to vector<8x128xf32>
    %61 = arith.mulf %60, %59 : vector<8x128xf32>
    %62 = arith.addf %57, %61 : vector<8x128xf32>
    %c1_37 = arith.constant 1 : index
    %c5_38 = arith.constant 5 : index
    %63 = memref.load %arg1[%c1_37, %c5_38] : memref<4x8xf32, #tpu.memory_space<smem>>
    %c0_39 = arith.constant 0 : index
    %c640_40 = arith.constant 640 : index
    %64 = vector.load %arg3[%c0_39, %c640_40] : memref<8x1024xf32, #tpu.memory_space<vmem>>, vector<8x128xf32>
    %65 = vector.broadcast %63 : f32 to vector<8x128xf32>
    %66 = arith.mulf %65, %64 : vector<8x128xf32>
    %67 = arith.addf %62, %66 : vector<8x128xf32>
    %c1_41 = arith.constant 1 : index
    %c6_42 = arith.constant 6 : index
    %68 = memref.load %arg1[%c1_41, %c6_42] : memref<4x8xf32, #tpu.memory_space<smem>>
    %c0_43 = arith.constant 0 : index
    %c768_44 = arith.constant 768 : index
    %69 = vector.load %arg3[%c0_43, %c768_44] : memref<8x1024xf32, #tpu.memory_space<vmem>>, vector<8x128xf32>
    %70 = vector.broadcast %68 : f32 to vector<8x128xf32>
    %71 = arith.mulf %70, %69 : vector<8x128xf32>
    %72 = arith.addf %67, %71 : vector<8x128xf32>
    %c1_45 = arith.constant 1 : index
    %c7_46 = arith.constant 7 : index
    %73 = memref.load %arg1[%c1_45, %c7_46] : memref<4x8xf32, #tpu.memory_space<smem>>
    %c0_47 = arith.constant 0 : index
    %c896_48 = arith.constant 896 : index
    %74 = vector.load %arg3[%c0_47, %c896_48] : memref<8x1024xf32, #tpu.memory_space<vmem>>, vector<8x128xf32>
    %75 = vector.broadcast %73 : f32 to vector<8x128xf32>
    %76 = arith.mulf %75, %74 : vector<8x128xf32>
    %77 = arith.addf %72, %76 : vector<8x128xf32>
    %c2_49 = arith.constant 2 : index
    %c0_50 = arith.constant 0 : index
    %78 = memref.load %arg1[%c2_49, %c0_50] : memref<4x8xf32, #tpu.memory_space<smem>>
    %c0_51 = arith.constant 0 : index
    %c0_52 = arith.constant 0 : index
    %79 = vector.load %arg3[%c0_51, %c0_52] : memref<8x1024xf32, #tpu.memory_space<vmem>>, vector<8x128xf32>
    %80 = vector.broadcast %78 : f32 to vector<8x128xf32>
    %81 = arith.mulf %80, %79 : vector<8x128xf32>
    %c2_53 = arith.constant 2 : index
    %c1_54 = arith.constant 1 : index
    %82 = memref.load %arg1[%c2_53, %c1_54] : memref<4x8xf32, #tpu.memory_space<smem>>
    %c0_55 = arith.constant 0 : index
    %c128_56 = arith.constant 128 : index
    %83 = vector.load %arg3[%c0_55, %c128_56] : memref<8x1024xf32, #tpu.memory_space<vmem>>, vector<8x128xf32>
    %84 = vector.broadcast %82 : f32 to vector<8x128xf32>
    %85 = arith.mulf %84, %83 : vector<8x128xf32>
    %86 = arith.addf %81, %85 : vector<8x128xf32>
    %c2_57 = arith.constant 2 : index
    %c2_58 = arith.constant 2 : index
    %87 = memref.load %arg1[%c2_57, %c2_58] : memref<4x8xf32, #tpu.memory_space<smem>>
    %c0_59 = arith.constant 0 : index
    %c256_60 = arith.constant 256 : index
    %88 = vector.load %arg3[%c0_59, %c256_60] : memref<8x1024xf32, #tpu.memory_space<vmem>>, vector<8x128xf32>
    %89 = vector.broadcast %87 : f32 to vector<8x128xf32>
    %90 = arith.mulf %89, %88 : vector<8x128xf32>
    %91 = arith.addf %86, %90 : vector<8x128xf32>
    %c2_61 = arith.constant 2 : index
    %c3_62 = arith.constant 3 : index
    %92 = memref.load %arg1[%c2_61, %c3_62] : memref<4x8xf32, #tpu.memory_space<smem>>
    %c0_63 = arith.constant 0 : index
    %c384_64 = arith.constant 384 : index
    %93 = vector.load %arg3[%c0_63, %c384_64] : memref<8x1024xf32, #tpu.memory_space<vmem>>, vector<8x128xf32>
    %94 = vector.broadcast %92 : f32 to vector<8x128xf32>
    %95 = arith.mulf %94, %93 : vector<8x128xf32>
    %96 = arith.addf %91, %95 : vector<8x128xf32>
    %c2_65 = arith.constant 2 : index
    %c4_66 = arith.constant 4 : index
    %97 = memref.load %arg1[%c2_65, %c4_66] : memref<4x8xf32, #tpu.memory_space<smem>>
    %c0_67 = arith.constant 0 : index
    %c512_68 = arith.constant 512 : index
    %98 = vector.load %arg3[%c0_67, %c512_68] : memref<8x1024xf32, #tpu.memory_space<vmem>>, vector<8x128xf32>
    %99 = vector.broadcast %97 : f32 to vector<8x128xf32>
    %100 = arith.mulf %99, %98 : vector<8x128xf32>
    %101 = arith.addf %96, %100 : vector<8x128xf32>
    %c2_69 = arith.constant 2 : index
    %c5_70 = arith.constant 5 : index
    %102 = memref.load %arg1[%c2_69, %c5_70] : memref<4x8xf32, #tpu.memory_space<smem>>
    %c0_71 = arith.constant 0 : index
    %c640_72 = arith.constant 640 : index
    %103 = vector.load %arg3[%c0_71, %c640_72] : memref<8x1024xf32, #tpu.memory_space<vmem>>, vector<8x128xf32>
    %104 = vector.broadcast %102 : f32 to vector<8x128xf32>
    %105 = arith.mulf %104, %103 : vector<8x128xf32>
    %106 = arith.addf %101, %105 : vector<8x128xf32>
    %c2_73 = arith.constant 2 : index
    %c6_74 = arith.constant 6 : index
    %107 = memref.load %arg1[%c2_73, %c6_74] : memref<4x8xf32, #tpu.memory_space<smem>>
    %c0_75 = arith.constant 0 : index
    %c768_76 = arith.constant 768 : index
    %108 = vector.load %arg3[%c0_75, %c768_76] : memref<8x1024xf32, #tpu.memory_space<vmem>>, vector<8x128xf32>
    %109 = vector.broadcast %107 : f32 to vector<8x128xf32>
    %110 = arith.mulf %109, %108 : vector<8x128xf32>
    %111 = arith.addf %106, %110 : vector<8x128xf32>
    %c2_77 = arith.constant 2 : index
    %c7_78 = arith.constant 7 : index
    %112 = memref.load %arg1[%c2_77, %c7_78] : memref<4x8xf32, #tpu.memory_space<smem>>
    %c0_79 = arith.constant 0 : index
    %c896_80 = arith.constant 896 : index
    %113 = vector.load %arg3[%c0_79, %c896_80] : memref<8x1024xf32, #tpu.memory_space<vmem>>, vector<8x128xf32>
    %114 = vector.broadcast %112 : f32 to vector<8x128xf32>
    %115 = arith.mulf %114, %113 : vector<8x128xf32>
    %116 = arith.addf %111, %115 : vector<8x128xf32>
    %c3_81 = arith.constant 3 : index
    %c0_82 = arith.constant 0 : index
    %117 = memref.load %arg1[%c3_81, %c0_82] : memref<4x8xf32, #tpu.memory_space<smem>>
    %c0_83 = arith.constant 0 : index
    %c0_84 = arith.constant 0 : index
    %118 = vector.load %arg3[%c0_83, %c0_84] : memref<8x1024xf32, #tpu.memory_space<vmem>>, vector<8x128xf32>
    %119 = vector.broadcast %117 : f32 to vector<8x128xf32>
    %120 = arith.mulf %119, %118 : vector<8x128xf32>
    %c3_85 = arith.constant 3 : index
    %c1_86 = arith.constant 1 : index
    %121 = memref.load %arg1[%c3_85, %c1_86] : memref<4x8xf32, #tpu.memory_space<smem>>
    %c0_87 = arith.constant 0 : index
    %c128_88 = arith.constant 128 : index
    %122 = vector.load %arg3[%c0_87, %c128_88] : memref<8x1024xf32, #tpu.memory_space<vmem>>, vector<8x128xf32>
    %123 = vector.broadcast %121 : f32 to vector<8x128xf32>
    %124 = arith.mulf %123, %122 : vector<8x128xf32>
    %125 = arith.addf %120, %124 : vector<8x128xf32>
    %c3_89 = arith.constant 3 : index
    %c2_90 = arith.constant 2 : index
    %126 = memref.load %arg1[%c3_89, %c2_90] : memref<4x8xf32, #tpu.memory_space<smem>>
    %c0_91 = arith.constant 0 : index
    %c256_92 = arith.constant 256 : index
    %127 = vector.load %arg3[%c0_91, %c256_92] : memref<8x1024xf32, #tpu.memory_space<vmem>>, vector<8x128xf32>
    %128 = vector.broadcast %126 : f32 to vector<8x128xf32>
    %129 = arith.mulf %128, %127 : vector<8x128xf32>
    %130 = arith.addf %125, %129 : vector<8x128xf32>
    %c3_93 = arith.constant 3 : index
    %c3_94 = arith.constant 3 : index
    %131 = memref.load %arg1[%c3_93, %c3_94] : memref<4x8xf32, #tpu.memory_space<smem>>
    %c0_95 = arith.constant 0 : index
    %c384_96 = arith.constant 384 : index
    %132 = vector.load %arg3[%c0_95, %c384_96] : memref<8x1024xf32, #tpu.memory_space<vmem>>, vector<8x128xf32>
    %133 = vector.broadcast %131 : f32 to vector<8x128xf32>
    %134 = arith.mulf %133, %132 : vector<8x128xf32>
    %135 = arith.addf %130, %134 : vector<8x128xf32>
    %c3_97 = arith.constant 3 : index
    %c4_98 = arith.constant 4 : index
    %136 = memref.load %arg1[%c3_97, %c4_98] : memref<4x8xf32, #tpu.memory_space<smem>>
    %c0_99 = arith.constant 0 : index
    %c512_100 = arith.constant 512 : index
    %137 = vector.load %arg3[%c0_99, %c512_100] : memref<8x1024xf32, #tpu.memory_space<vmem>>, vector<8x128xf32>
    %138 = vector.broadcast %136 : f32 to vector<8x128xf32>
    %139 = arith.mulf %138, %137 : vector<8x128xf32>
    %140 = arith.addf %135, %139 : vector<8x128xf32>
    %c3_101 = arith.constant 3 : index
    %c5_102 = arith.constant 5 : index
    %141 = memref.load %arg1[%c3_101, %c5_102] : memref<4x8xf32, #tpu.memory_space<smem>>
    %c0_103 = arith.constant 0 : index
    %c640_104 = arith.constant 640 : index
    %142 = vector.load %arg3[%c0_103, %c640_104] : memref<8x1024xf32, #tpu.memory_space<vmem>>, vector<8x128xf32>
    %143 = vector.broadcast %141 : f32 to vector<8x128xf32>
    %144 = arith.mulf %143, %142 : vector<8x128xf32>
    %145 = arith.addf %140, %144 : vector<8x128xf32>
    %c3_105 = arith.constant 3 : index
    %c6_106 = arith.constant 6 : index
    %146 = memref.load %arg1[%c3_105, %c6_106] : memref<4x8xf32, #tpu.memory_space<smem>>
    %c0_107 = arith.constant 0 : index
    %c768_108 = arith.constant 768 : index
    %147 = vector.load %arg3[%c0_107, %c768_108] : memref<8x1024xf32, #tpu.memory_space<vmem>>, vector<8x128xf32>
    %148 = vector.broadcast %146 : f32 to vector<8x128xf32>
    %149 = arith.mulf %148, %147 : vector<8x128xf32>
    %150 = arith.addf %145, %149 : vector<8x128xf32>
    %c3_109 = arith.constant 3 : index
    %c7_110 = arith.constant 7 : index
    %151 = memref.load %arg1[%c3_109, %c7_110] : memref<4x8xf32, #tpu.memory_space<smem>>
    %c0_111 = arith.constant 0 : index
    %c896_112 = arith.constant 896 : index
    %152 = vector.load %arg3[%c0_111, %c896_112] : memref<8x1024xf32, #tpu.memory_space<vmem>>, vector<8x128xf32>
    %153 = vector.broadcast %151 : f32 to vector<8x128xf32>
    %154 = arith.mulf %153, %152 : vector<8x128xf32>
    %155 = arith.addf %150, %154 : vector<8x128xf32>
    %156 = tpu.concatenate %38, %77, %116, %155 in 1 : vector<8x128xf32>, vector<8x128xf32>, vector<8x128xf32>, vector<8x128xf32> -> vector<8x512xf32>
    %c0_113 = arith.constant 0 : index
    %c0_114 = arith.constant 0 : index
    %157 = vector.load %arg2[%c0_113, %c0_114] : memref<1x512xf32, #tpu.memory_space<vmem>>, vector<1x512xf32>
    %158 = vector.broadcast %157 : vector<1x512xf32> to vector<8x512xf32>
    %159 = arith.addf %156, %158 : vector<8x512xf32>
    %cst = arith.constant 0.000000e+00 : f32
    %160 = vector.broadcast %cst : f32 to vector<8x512xf32>
    %161 = arith.maximumf %159, %160 : vector<8x512xf32>
    %c0_115 = arith.constant 0 : index
    %c0_116 = arith.constant 0 : index
    %162 = vector.load %arg4[%c0_115, %c0_116] : memref<512x128xf32, #tpu.memory_space<vmem>>, vector<512x128xf32>
    %cst_117 = arith.constant dense<0.000000e+00> : vector<8x128xf32>
    %163 = tpu.matmul %161, %162, %cst_117 {dimension_numbers = #tpu.dot_dimension_numbers<[1], [0], [0], [1], [0, 0, 1, 1], [], []>} : vector<8x512xf32>, vector<512x128xf32>, vector<8x128xf32> -> vector<8x128xf32>
    %c0_118 = arith.constant 0 : index
    %c0_119 = arith.constant 0 : index
    %164 = vector.load %arg5[%c0_118, %c0_119] : memref<1x128xf32, #tpu.memory_space<vmem>>, vector<1x128xf32>
    %165 = vector.broadcast %164 : vector<1x128xf32> to vector<8x128xf32>
    %166 = arith.addf %163, %165 : vector<8x128xf32>
    %cst_120 = arith.constant dense<0xFF800000> : vector<8xf32>
    %167 = vector.multi_reduction <maximumf>, %166, %cst_120 [1] : vector<8x128xf32> to vector<8xf32>
    %168 = vector.shape_cast %167 : vector<8xf32> to vector<8x1xf32>
    %169 = vector.broadcast %168 : vector<8x1xf32> to vector<8x128xf32>
    %170 = arith.subf %166, %169 : vector<8x128xf32>
    %171 = math.exp %170 : vector<8x128xf32>
    %cst_121 = arith.constant dense<0.000000e+00> : vector<8xf32>
    %172 = vector.multi_reduction <add>, %171, %cst_121 [1] : vector<8x128xf32> to vector<8xf32>
    %173 = vector.shape_cast %172 : vector<8xf32> to vector<8x1xf32>
    %174 = tpu.reciprocal %173 : vector<8x1xf32> -> vector<8x1xf32>
    %175 = vector.broadcast %174 : vector<8x1xf32> to vector<8x128xf32>
    %176 = arith.mulf %171, %175 : vector<8x128xf32>
    %c0_122 = arith.constant 0 : index
    %c0_123 = arith.constant 0 : index
    %177 = vector.load %arg6[%c0_122, %c0_123] : memref<8x128xf32, #tpu.memory_space<vmem>>, vector<8x128xf32>
    tpu.vector_store %arg6[%c0_122, %c0_123], %176 {strides = array<i32>} : memref<8x128xf32, #tpu.memory_space<vmem>>, vector<8x128xf32>,
    return
  }
  func.func @transform_0(%arg0: i32) -> (i32, i32) {
    %c0_i32 = arith.constant 0 : i32
    %c0_i32_0 = arith.constant 0 : i32
    %c0_i32_1 = arith.constant 0 : i32
    return %c0_i32, %c0_i32_0 : i32, i32
  }
  func.func @transform_1(%arg0: i32) -> (i32, i32) {
    %c0_i32 = arith.constant 0 : i32
    %c0_i32_0 = arith.constant 0 : i32
    %c0_i32_1 = arith.constant 0 : i32
    return %c0_i32, %c0_i32_0 : i32, i32
  }
  func.func @transform_2(%arg0: i32) -> (i32, i32) {
    %c0_i32 = arith.constant 0 : i32
    %c0_i32_0 = arith.constant 0 : i32
    return %arg0, %c0_i32 : i32, i32
  }
  func.func @transform_3(%arg0: i32) -> (i32, i32) {
    %c0_i32 = arith.constant 0 : i32
    %c0_i32_0 = arith.constant 0 : i32
    %c0_i32_1 = arith.constant 0 : i32
    return %c0_i32, %c0_i32_0 : i32, i32
  }
  func.func @transform_4(%arg0: i32) -> (i32, i32) {
    %c0_i32 = arith.constant 0 : i32
    %c0_i32_0 = arith.constant 0 : i32
    %c0_i32_1 = arith.constant 0 : i32
    return %c0_i32, %c0_i32_0 : i32, i32
  }
  func.func @transform_5(%arg0: i32) -> (i32, i32) {
    %c0_i32 = arith.constant 0 : i32
    %c0_i32_0 = arith.constant 0 : i32
    return %arg0, %c0_i32 : i32, i32
  }
}

</mosaic_0001>

<bundles_post_ra>
// kernel: tpu_custom_call.1
= control target key start
LH: loop header
LB: loop body
LE: loop exit
PB: predicated region body
PF: predicated region fallthrough
CT: control target
= control target key end

     0   :  { %10 = vsyncpa [#allocation5], 0  ;;  %s792_s0 = inlined_call_operand.hbm [shape: f32[4,8], index: 0, kind: input, shape index: {}]   ;;  %s793_s1 = inlined_call_operand.hbm [shape: f32[1,512], index: 1, kind: input, shape index: {}]   ;;  %s794_s2 = inlined_call_operand.hbm [shape: f32[8,1024], index: 2, kind: input, shape index: {}]   ;;  %s795_s3 = inlined_call_operand.hbm [shape: f32[512,128], index: 3, kind: input, shape index: {}]   ;;  %s796_s4 = inlined_call_operand.vmem [shape: f32[1,128], index: 4, kind: input, shape index: {}]   ;;  %s797_s5 = inlined_call_operand.hbm [shape: f32[8,128], index: 5, kind: output, shape index: {}]  }
   0x1   :  { %11 = vsyncpa [#allocation3], 0 }
   0x2   :  { %12 = vsyncpa [#allocation8], 0  ;;  %s39_s20 = sshll.u32 %s794_s2, 4  ;;  %s40_s20 = int_to_ptr.hbm [resolvable:$true] %s39_s20 }
   0x3   :  { %13 = vsyncpa [#allocation4], 0  ;;  %s576_s21 = smov [#allocation7]   ;;  %s19_s25 = sshll.u32 %s792_s0, 4  ;;  %s20_s25 = int_to_ptr.hbm [resolvable:$true] %s19_s25 }
   0x4   :  { %s41_s22 = sshll.u32 %s576_s21, 4  ;;  %s577_s26 = smov [#allocation2]   ;;  %s42_s22 = int_to_ptr.vmem [resolvable:$true] %s41_s22 }
   0x5   :  { %44 = dma.hbm_to_vmem [thread:$0]  %s40_s20, 1024, %s42_s22, [#allocation8]  }
   0x6   :  { %22 = dma.hbm_to_smem %s20_s25, 64, %s577_s26, [#allocation5]  }
   0x7   :  { %s28_s29 = sshll.u32 %s793_s1, 4  ;;  %s578_s30 = smov [#allocation6]   ;;  %s29_s29 = int_to_ptr.hbm [resolvable:$true] %s28_s29 }
   0x8   :  { %s30_s2 = sshll.u32 %s578_s30, 4  ;;  %s49_s8 = sshll.u32 %s795_s3, 4  ;;  %s31_s2 = int_to_ptr.vmem [resolvable:$true] %s30_s2  ;;  %s50_s8 = int_to_ptr.hbm [resolvable:$true] %s49_s8 }
   0x9   :  { %33 = dma.hbm_to_vmem [thread:$0]  %s29_s29, 64, %s31_s2, [#allocation3]  }
   0xa   :  { %s579_s9 = smov [#allocation9]   ;;  %s580_s10 = smov 128  }
   0xb   :  { %s51_s0 = sshll.u32 %s579_s9, 4  ;;  %s581_s11 = smov 8   ;;  %s52_s0 = int_to_ptr.vmem [resolvable:$true] %s51_s0 }
   0xc   :  { %57 = dma.hbm_to_vmem [thread:$0]  %s50_s8, 8192, %s52_s0, [#allocation8], %s580_s10, %s580_s10, %s581_s11  }
   0xd   :  { %568 = dma.done.wait [#allocation5], 64  }
   0xe   :  { %569 = vsyncadd [#allocation5], 4294967232 }
   0xf   :  { %570 = dma.done.wait [#allocation3], 64  }
  0x10   :  { %571 = vsyncadd [#allocation3], 4294967232 }
  0x11   :  { %572 = dma.done.wait [#allocation8], 9216  }
  0x12   :  { %573 = vsyncadd [#allocation8], 4294958080 }
  0x13   :  { %76 = sfence }
  0x14   :  { %v274_v0 = vld [vmem:[#allocation9 + $0x178] sm:$0xff]  ;;  %v273_v2 = vld [vmem:[#allocation9 + $0x170] sm:$0xff]  ;;  %s625_s1 = sld [smem:[#allocation2 + $0x100]]  ;;  %v272_v6 = vld [vmem:[#allocation9 + $0x168] sm:$0xff] }
  0x15   :  { %v242_v1 = vld [vmem:[#allocation9 + $0x78] sm:$0xff]  ;;  %335 = vmatpush.msra.mxu2 %v274_v0  ;;  %v241_v4 = vld [vmem:[#allocation9 + $0x70] sm:$0xff]  ;;  %s627_s3 = sld [smem:[#allocation2 + $0x101]]  ;;  %v240_v8 = vld [vmem:[#allocation9 + $0x68] sm:$0xff] }
  0x16   :  { %295 = vmatpush.msra.mxu0 %v242_v1  ;;  %v290_v3 = vld [vmem:[#allocation9 + $0x1f8] sm:$0xff]  ;;  %v289_v7 = vld [vmem:[#allocation9 + $0x1f0] sm:$0xff]  ;;  %s629_s12 = sld [smem:[#allocation2 + $0x102]]  ;;  %v288_v10 = vld [vmem:[#allocation9 + $0x1e8] sm:$0xff] }
  0x17   :  { %v258_v5 = vld [vmem:[#allocation9 + $0xf8] sm:$0xff]  ;;  %355 = vmatpush.msra.mxu3 %v290_v3  ;;  %336 = vmatpush.msra.mxu2 %v273_v2  ;;  %v257_v9 = vld [vmem:[#allocation9 + $0xf0] sm:$0xff]  ;;  %s631_s13 = sld [smem:[#allocation2 + $0x103]]  ;;  %v271_v11 = vld [vmem:[#allocation9 + $0x160] sm:$0xff] }
  0x18   :  { %315 = vmatpush.msra.mxu1 %v258_v5  ;;  %296 = vmatpush.msra.mxu0 %v241_v4  ;;  %v239_v12 = vld [vmem:[#allocation9 + $0x60] sm:$0xff]  ;;  %v256_v13 = vld [vmem:[#allocation9 + $0xe8] sm:$0xff]  ;;  %s633_s14 = sld [smem:[#allocation2 + $0x104]]  ;;  %v270_v16 = vld [vmem:[#allocation9 + $0x158] sm:$0xff] }
  0x19   :  { %356 = vmatpush.msra.mxu3 %v289_v7  ;;  %337 = vmatpush.msra.mxu2 %v272_v6  ;;  %v287_v14 = vld [vmem:[#allocation9 + $0x1e0] sm:$0xff]  ;;  %s635_s15 = sld [smem:[#allocation2 + $0x105]]  ;;  %v238_v17 = vld [vmem:[#allocation9 + $0x58] sm:$0xff]  ;;  %v269_v20 = vld [vmem:[#allocation9 + $0x150] sm:$0xff] }
  0x1a   :  { %316 = vmatpush.msra.mxu1 %v257_v9  ;;  %297 = vmatpush.msra.mxu0 %v240_v8  ;;  %v255_v15 = vld [vmem:[#allocation9 + $0xe0] sm:$0xff]  ;;  %s637_s16 = sld [smem:[#allocation2 + $0x106]]  ;;  %v286_v18 = vld [vmem:[#allocation9 + $0x1d8] sm:$0xff]  ;;  %v237_v21 = vld [vmem:[#allocation9 + $0x50] sm:$0xff]  ;;  %v148_v45 = vstv %s625_s1 }
  0x1b   :  { %357 = vmatpush.msra.mxu3 %v288_v10  ;;  %338 = vmatpush.msra.mxu2 %v271_v11  ;;  %v254_v19 = vld [vmem:[#allocation9 + $0xd8] sm:$0xff]  ;;  %s639_s17 = sld [smem:[#allocation2 + $0x107]]  ;;  %v285_v22 = vld [vmem:[#allocation9 + $0x1d0] sm:$0xff]  ;;  %v268_v24 = vld [vmem:[#allocation9 + $0x148] sm:$0xff]  ;;  %v151_v46 = vstv %s627_s3 }
  0x1c   :  { %317 = vmatpush.msra.mxu1 %v256_v13  ;;  %298 = vmatpush.msra.mxu0 %v239_v12  ;;  %s641_s18 = sld [smem:[#allocation2]]  ;;  %v253_v23 = vld [vmem:[#allocation9 + $0xd0] sm:$0xff]  ;;  %v236_v25 = vld [vmem:[#allocation9 + $0x48] sm:$0xff]  ;;  %v267_v28 = vld [vmem:[#allocation9 + $0x140] sm:$0xff]  ;;  %v155_v47 = vstv %s629_s12 }
  0x1d   :  { %358 = vmatpush.msra.mxu3 %v287_v14  ;;  %339 = vmatpush.msra.mxu2 %v270_v16  ;;  %s643_s19 = sld [smem:[#allocation2 + $0x1]]  ;;  %v284_v26 = vld [vmem:[#allocation9 + $0x1c8] sm:$0xff]  ;;  %v235_v29 = vld [vmem:[#allocation9 + $0x40] sm:$0xff]  ;;  %v266_v32 = vld [vmem:[#allocation9 + $0x138] sm:$0xff]  ;;  %v159_v48 = vstv %s631_s13 }
  0x1e   :  { %318 = vmatpush.msra.mxu1 %v255_v15  ;;  %299 = vmatpush.msra.mxu0 %v238_v17  ;;  %s645_s20 = sld [smem:[#allocation2 + $0x2]]  ;;  %v252_v27 = vld [vmem:[#allocation9 + $0xc8] sm:$0xff]  ;;  %v283_v30 = vld [vmem:[#allocation9 + $0x1c0] sm:$0xff]  ;;  %v234_v33 = vld [vmem:[#allocation9 + $0x38] sm:$0xff]  ;;  %v163_v52 = vstv %s633_s14 }
  0x1f   :  { %359 = vmatpush.msra.mxu3 %v286_v18  ;;  %340 = vmatpush.msra.mxu2 %v269_v20  ;;  %s647_s21 = sld [smem:[#allocation2 + $0x3]]  ;;  %v251_v31 = vld [vmem:[#allocation9 + $0xc0] sm:$0xff]  ;;  %v282_v34 = vld [vmem:[#allocation9 + $0x1b8] sm:$0xff]  ;;  %v265_v36 = vld [vmem:[#allocation9 + $0x130] sm:$0xff]  ;;  %v167_v53 = vstv %s635_s15 }
  0x20   :  { %319 = vmatpush.msra.mxu1 %v254_v19  ;;  %300 = vmatpush.msra.mxu0 %v237_v21  ;;  %s649_s22 = sld [smem:[#allocation2 + $0x4]]  ;;  %v250_v35 = vld [vmem:[#allocation9 + $0xb8] sm:$0xff]  ;;  %v233_v37 = vld [vmem:[#allocation9 + $0x30] sm:$0xff]  ;;  %v264_v38 = vld [vmem:[#allocation9 + $0x128] sm:$0xff]  ;;  %v171_v54 = vstv %s637_s16 }
  0x21   :  { %360 = vmatpush.msra.mxu3 %v285_v22  ;;  %341 = vmatpush.msra.mxu2 %v268_v24  ;;  %s651_s23 = sld [smem:[#allocation2 + $0x5]]  ;;  %v281_v39 = vld [vmem:[#allocation9 + $0x1b0] sm:$0xff]  ;;  %v232_v40 = vld [vmem:[#allocation9 + $0x28] sm:$0xff]  ;;  %v263_v42 = vld [vmem:[#allocation9 + $0x120] sm:$0xff]  ;;  %v175_v55 = vstv %s639_s17 }
  0x22   :  { %320 = vmatpush.msra.mxu1 %v253_v23  ;;  %301 = vmatpush.msra.mxu0 %v236_v25  ;;  %s653_s24 = sld [smem:[#allocation2 + $0x6]]  ;;  %v249_v41 = vld [vmem:[#allocation9 + $0xb0] sm:$0xff]  ;;  %v280_v43 = vld [vmem:[#allocation9 + $0x1a8] sm:$0xff]  ;;  %v231_v44 = vld [vmem:[#allocation9 + $0x20] sm:$0xff]  ;;  %v79_v61 = vstv %s641_s18  ;;  %s405_s18 = sshll.u32 %s797_s5, 4  ;;  %s406_s18 = int_to_ptr.hbm [resolvable:$true] %s405_s18 }
  0x23   :  { %361 = vmatpush.msra.mxu3 %v284_v26  ;;  %342 = vmatpush.msra.mxu2 %v267_v28  ;;  %s655_s25 = sld [smem:[#allocation2 + $0x7]]  ;;  %v248_v49 = vld [vmem:[#allocation9 + $0xa8] sm:$0xff]  ;;  %v279_v50 = vld [vmem:[#allocation9 + $0x1a0] sm:$0xff]  ;;  %v262_v56 = vld [vmem:[#allocation9 + $0x118] sm:$0xff]  ;;  %v83_v62 = vstv %s643_s19 }
  0x24   :  { %321 = vmatpush.msra.mxu1 %v252_v27  ;;  %302 = vmatpush.msra.mxu0 %v235_v29  ;;  %s657_s26 = sld [smem:[#allocation2 + $0x180]]  ;;  %v247_v51 = vld [vmem:[#allocation9 + $0xa0] sm:$0xff]  ;;  %v230_v57 = vld [vmem:[#allocation9 + $0x18] sm:$0xff]  ;;  %v675_v59 = vld [vmem:[#allocation7 + $0x8] sm:$0xff]  ;;  %v88_v63 = vstv %s645_s20 }
  0x25   :  { %362 = vmatpush.msra.mxu3 %v283_v30  ;;  %343 = vmatpush.msra.mxu2 %v266_v32  ;;  %s659_s27 = sld [smem:[#allocation2 + $0x181]]  ;;  %v673_v58 = vld [vmem:[#allocation7] sm:$0xff]  ;;  %v677_v60 = vld [vmem:[#allocation7 + $0x10] sm:$0xff]  ;;  %v93_v0 = vstv %s647_s21  ;;  %v685_v1 = vld [vmem:[#allocation7 + $0x18] sm:$0xff]  ;;  %v152_v5 = vmul.f32 %v151_v46, %v675_v59  ;;  %v84_v24 = vmul.f32 %v83_v62, %v675_v59 }
  0x26   :  { %322 = vmatpush.msra.mxu1 %v251_v31  ;;  %303 = vmatpush.msra.mxu0 %v234_v33  ;;  %s665_s28 = sld [smem:[#allocation2 + $0x182]]  ;;  %v687_v2 = vld [vmem:[#allocation7 + $0x20] sm:$0xff]  ;;  %v689_v3 = vld [vmem:[#allocation7 + $0x28] sm:$0xff]  ;;  %v149_v4 = vmul.f32 %v148_v45, %v673_v58  ;;  %v156_v6 = vmul.f32 %v155_v47, %v677_v60  ;;  %v98_v7 = vstv %s649_s22  ;;  %v697_v8 = vld [vmem:[#allocation7 + $0x30] sm:$0xff]  ;;  %v160_v10 = vmul.f32 %v159_v48, %v685_v1 }
  0x27   :  { %363 = vmatpush.msra.mxu3 %v282_v34  ;;  %344 = vmatpush.msra.mxu2 %v265_v36  ;;  %s671_s29 = sld [smem:[#allocation2 + $0x183]]  ;;  %v699_v9 = vld [vmem:[#allocation7 + $0x38] sm:$0xff]  ;;  %v164_v11 = vmul.f32 %v163_v52, %v687_v2  ;;  %v103_v13 = vstv %s651_s23  ;;  %v710_v18 = vmul.f32 %v167_v53, %v689_v3  ;;  %v713_v19 = vmul.f32 %v171_v54, %v697_v8  ;;  %v261_v21 = vld [vmem:[#allocation9 + $0x110] sm:$0xff]  ;;  %v260_v33 = vld [vmem:[#allocation9 + $0x108] sm:$0xff] }
  0x28   :  { %323 = vmatpush.msra.mxu1 %v250_v35  ;;  %304 = vmatpush.msra.mxu0 %v233_v37  ;;  %s683_s30 = sld [smem:[#allocation2 + $0x184]]  ;;  %v703_v12 = vld [vmem:[#allocation6] sm:$0xf]  ;;  %v108_v14 = vstv %s653_s24  ;;  %v153_v17 = vadd.f32 %v152_v5, %v149_v4  ;;  %v229_v22 = vld [vmem:[#allocation9 + $0x10] sm:$0xff]  ;;  %v80_v23 = vmul.f32 %v79_v61, %v673_v58  ;;  %v89_v25 = vmul.f32 %v88_v63, %v677_v60  ;;  %v228_v34 = vld [vmem:[#allocation9 + $0x8] sm:$0xff] }
  0x29   :  { %364 = vmatpush.msra.mxu3 %v281_v39  ;;  %345 = vmatpush.msra.mxu2 %v264_v38  ;;  %s695_s2 = sld [smem:[#allocation2 + $0x185]]  ;;  %v278_v15 = vld [vmem:[#allocation9 + $0x198] sm:$0xff]  ;;  %v113_v20 = vstv %s655_s25  ;;  %v277_v27 = vld [vmem:[#allocation9 + $0x190] sm:$0xff]  ;;  %v725_v30 = vmul.f32 %v175_v55, %v699_v9  ;;  %v213_v31 = vperm.slane %v703_v12, 2  ;;  %v94_v36 = vmul.f32 %v93_v0, %v685_v1  ;;  %v276_v39 = vld [vmem:[#allocation9 + $0x188] sm:$0xff] }
  0x2a   :  { %324 = vmatpush.msra.mxu1 %v249_v41  ;;  %305 = vmatpush.msra.mxu0 %v232_v40  ;;  %s707_s6 = sld [smem:[#allocation2 + $0x186]]  ;;  %v246_v16 = vld [vmem:[#allocation9 + $0x98] sm:$0xff]  ;;  %v179_v26 = vstv %s657_s26  ;;  %v245_v28 = vld [vmem:[#allocation9 + $0x90] sm:$0xff]  ;;  %v157_v29 = vadd.f32 %v156_v6, %v153_v17  ;;  %v85_v35 = vadd.f32 %v84_v24, %v80_v23  ;;  %v99_v37 = vmul.f32 %v98_v7, %v687_v2  ;;  %v244_v41 = vld [vmem:[#allocation9 + $0x88] sm:$0xff] }
  0x2b   :  { %365 = vmatpush.msra.mxu3 %v280_v43  ;;  %346 = vmatpush.msra.mxu2 %v263_v42  ;;  %s716_s7 = sld [smem:[#allocation2 + $0x187]]  ;;  %v182_v32 = vstv %s659_s27  ;;  %v104_v42 = vmul.f32 %v103_v13, %v689_v3  ;;  %v180_v43 = vmul.f32 %v179_v26, %v673_v58  ;;  %v259_v45 = vld [vmem:[#allocation9 + $0x100] sm:$0xff]  ;;  %v109_v53 = vmul.f32 %v108_v14, %v697_v8 }
  0x2c   :  { %325 = vmatpush.msra.mxu1 %v248_v49  ;;  %306 = vmatpush.msra.mxu0 %v231_v44  ;;  %s722_s8 = sld [smem:[#allocation2 + $0x80]]  ;;  %v186_v38 = vstv %s665_s28  ;;  %v161_v40 = vadd.f32 %v160_v10, %v157_v29  ;;  %v227_v46 = vld [vmem:[#allocation9] sm:$0xff]  ;;  %v90_v47 = vadd.f32 %v89_v25, %v85_v35  ;;  %v183_v48 = vmul.f32 %v182_v32, %v675_v59 }
  0x2d   :  { %366 = vmatpush.msra.mxu3 %v279_v50  ;;  %347 = vmatpush.msra.mxu2 %v262_v56  ;;  %s729_s9 = sld [smem:[#allocation2 + $0x81]]  ;;  %v190_v44 = vstv %s671_s29  ;;  %v187_v49 = vmul.f32 %v186_v38, %v677_v60  ;;  %v275_v52 = vld [vmem:[#allocation9 + $0x180] sm:$0xff]  ;;  %v114_v54 = vmul.f32 %v113_v20, %v699_v9  ;;  %v211_v61 = vperm.slane %v703_v12, 0 }
  0x2e   :  { %326 = vmatpush.msra.mxu1 %v247_v51  ;;  %307 = vmatpush.msra.mxu0 %v230_v57  ;;  %s734_s0 = sld [smem:[#allocation2 + $0x82]]  ;;  %v194_v50 = vstv %s683_s30  ;;  %v165_v51 = vadd.f32 %v164_v11, %v161_v40  ;;  %v243_v56 = vld [vmem:[#allocation9 + $0x80] sm:$0xff]  ;;  %v95_v57 = vadd.f32 %v94_v36, %v90_v47  ;;  %v184_v62 = vadd.f32 %v183_v48, %v180_v43 }
  0x2f   :  { %367 = vmatpush.msra.mxu3 %v278_v15  ;;  %348 = vmatpush.msra.mxu2 %v261_v21  ;;  %s739_s10 = sld [smem:[#allocation2 + $0x83]]  ;;  %v198_v55 = vstv %s695_s2  ;;  %v191_v63 = vmul.f32 %v190_v44, %v685_v1  ;;  %v195_v4 = vmul.f32 %v194_v50, %v687_v2  ;;  %v214_v36 = vperm.slane %v703_v12, 3 }
  0x30   :  { %327 = vmatpush.msra.mxu1 %v246_v16  ;;  %308 = vmatpush.msra.mxu0 %v229_v22  ;;  %s744_s11 = sld [smem:[#allocation2 + $0x84]]  ;;  %v169_v0 = vadd.f32 %v710_v18, %v165_v51  ;;  %v199_v5 = vmul.f32 %v198_v55, %v689_v3  ;;  %v202_v6 = vstv %s707_s6  ;;  %v100_v7 = vadd.f32 %v99_v37, %v95_v57 }
  0x31   :  { %368 = vmatpush.msra.mxu3 %v277_v27  ;;  %349 = vmatpush.msra.mxu2 %v260_v33  ;;  %s749_s1 = sld [smem:[#allocation2 + $0x85]]  ;;  %v188_v10 = vadd.f32 %v187_v49, %v184_v62  ;;  %v206_v11 = vstv %s716_s7  ;;  %v203_v24 = vmul.f32 %v202_v6, %v697_v8  ;;  %v212_v49 = vperm.slane %v703_v12, 1 }
  0x32   :  { %328 = vmatpush.msra.mxu1 %v245_v28  ;;  %309 = vmatpush.msra.mxu0 %v228_v34  ;;  %s757_s3 = sld [smem:[#allocation2 + $0x86]]  ;;  %v117_v13 = vstv %s722_s8  ;;  %v173_v14 = vadd.f32 %v713_v19, %v169_v0  ;;  %v105_v18 = vadd.f32 %v104_v42, %v100_v7 }
  0x33   :  { %369 = vmatpush.msra.mxu3 %v276_v39  ;;  %350 = vmatpush.msra.mxu2 %v259_v45  ;;  %v118_v15 = vmul.f32 %v117_v13, %v673_v58  ;;  %v120_v16 = vstv %s729_s9  ;;  %s765_s12 = sld [smem:[#allocation2 + $0x87]]  ;;  %v192_v20 = vadd.f32 %v191_v63, %v188_v10 }
  0x34   :  { %329 = vmatpush.msra.mxu1 %v244_v41  ;;  %310 = vmatpush.msra.mxu0 %v227_v46  ;;  %v124_v17 = vstv %s734_s0  ;;  %v121_v21 = vmul.f32 %v120_v16, %v675_v59  ;;  %v177_v23 = vadd.f32 %v725_v30, %v173_v14  ;;  %v110_v26 = vadd.f32 %v109_v53, %v105_v18 }
  0x35   :  { %370 = vmatpush.msra.mxu3 %v275_v52  ;;  %v125_v22 = vmul.f32 %v124_v17, %v677_v60  ;;  %v128_v25 = vstv %s739_s10  ;;  %v196_v58 = vadd.f32 %v195_v4, %v192_v20  ;;  %v207_v59 = vmul.f32 %v206_v11, %v699_v9  ;;  %v455_v52 = vld [vmem:[%s796_s4] ss:$0 sm:$0xff]  ;;  %s582_s4 = smov [#allocation10]  }
  0x36   :  { %330 = vmatpush.msra.mxu1 %v243_v56  ;;  %v132_v19 = vstv %s744_s11  ;;  %v122_v27 = vadd.f32 %v121_v21, %v118_v15  ;;  %v129_v28 = vmul.f32 %v128_v25, %v685_v1  ;;  %v221_v29 = vadd.f32 %v213_v31, %v177_v23  ;;  %s403_s15 = sshll.u32 %s582_s4, 4  ;;  %s404_s15 = int_to_ptr.vmem [resolvable:$true] %s403_s15 }
  0x37   :  { %v136_v32 = vstv %s749_s1  ;;  %v115_v60 = vadd.f32 %v114_v54, %v110_v26  ;;  %v200_v33 = vadd.f32 %v199_v5, %v196_v58  ;;  %v133_v34 = vmul.f32 %v132_v19, %v687_v2 }
  0x38   :  { %v126_v30 = vadd.f32 %v125_v22, %v122_v27  ;;  %v225_v35 = vmax.f32 %v221_v29, 0.0  ;;  %v140_v37 = vstv %s757_s3  ;;  %v137_v1 = vmul.f32 %v136_v32, %v689_v3 }
  0x39   :  { %v219_v38 = vadd.f32 %v211_v61, %v115_v60  ;;  %v204_v39 = vadd.f32 %v203_v24, %v200_v33  ;;  %v144_v41 = vstv %s765_s12  ;;  %v141_v44 = vmul.f32 %v140_v37, %v697_v8 }
  0x3a   :  { %v130_v40 = vadd.f32 %v129_v28, %v126_v30  ;;  %351 = vmatmul.f32.vlgmr.msra.gmra.mxu2 %v225_v35  ;;  %v145_v2 = vmul.f32 %v144_v41, %v699_v9 }
  0x3b   :  { %v223_v31 = vmax.f32 %v219_v38, 0.0  ;;  %v208_v42 = vadd.f32 %v207_v59, %v204_v39 }
  0x3c   :  { %v134_v43 = vadd.f32 %v133_v34, %v130_v40 }
  0x3d   :  { %311 = vmatmul.f32.vlgmr.msra.gmra.mxu0 %v223_v31  ;;  %v222_v45 = vadd.f32 %v214_v36, %v208_v42 }
  0x3e   :  { %v138_v46 = vadd.f32 %v137_v1, %v134_v43 }
  0x3f   :  { %v226_v47 = vmax.f32 %v222_v45, 0.0 }
  0x40   :  { %v142_v48 = vadd.f32 %v141_v44, %v138_v46 }
  0x41   :  { %371 = vmatmul.f32.vlgmr.msra.gmra.mxu3 %v226_v47 }
  0x42   :  { %v146_v50 = vadd.f32 %v145_v2, %v142_v48 }
  0x44   :  { %v220_v51 = vadd.f32 %v212_v49, %v146_v50 }
  0x46   :  { %v224_v3 = vmax.f32 %v220_v51, 0.0 }
  0x48   :  { %331 = vmatmul.f32.vlgmr.msra.gmra.mxu1 %v224_v3 }
  0xba   :  { %v312_v53 = vpop.f32.mrf.mxu0 }
  0xbb   :  { %v313_v8 = vadd.f32 %v455_v52, %v312_v53 }
  0xbd   :  { %v352_v55 = vpop.f32.mrf.mxu2 }
  0xc4   :  { %v372_v57 = vpop.f32.mrf.mxu3 }
  0xc5   :  { %v332_v54 = vpop.f32.mrf.mxu1 }
  0xc6   :  { %v333_v56 = vadd.f32 %v332_v54, %v313_v8 }
  0xc8   :  { %v353_v9 = vadd.f32 %v352_v55, %v333_v56 }
  0xca   :  { %v373_v61 = vadd.f32 %v372_v57, %v353_v9 }
  0xcc   :  { %375 = vmax.xlane.f32.xlu0 %v373_v61 }
 0x13f   :  { %v376_v62 = vpop.xlane.xlu0 %375 }
 0x140   :  { %v377_v12 = vsub.f32 %v373_v61, %v376_v62 }
 0x142   :  { %v378_v63 = vmul.f32 1.442695, %v377_v12 }
 0x144   :  { %456 = vpow2.f32 %v378_v63 }
 0x14a   :  { %v457_v0 = vpop.eup %456 }
 0x14b   :  { %380 = vadd.xlane.f32.xlu0 %v457_v0 }
 0x1be   :  { %v381_v4 = vpop.xlane.xlu0 %380 }
 0x1bf   :  { %458 = vrcp.f32 %v381_v4  ;;  %v393_v10 = vand.u32 2147483648, %v381_v4  ;;  %v391_v13 = vand.u32 2147483647, %v381_v4  ;;  %vm387_vm1 = vweird.f32 %v381_v4 }
 0x1c1   :  { %v394_v15 = vor.u32 1.1754944e-38, %v393_v10  ;;  %vm392_vm3 = vcmp.eq.f32.partialorder %v391_v13, 8.507059e+37 }
 0x1c5   :  { %v459_v5 = vpop.eup %458 }
 0x1c6   :  { %v383_v6 = vmul.f32 %v459_v5, %v381_v4  ;;  %vm388_vm0 = vweird.f32 %v459_v5 }
 0x1c7   :  { %vm389_vm2 = vmor %vm387_vm1, %vm388_vm0 }
 0x1c8   :  { %v384_v7 = vsub.f32 1.0, %v383_v6 }
 0x1ca   :  { %v385_v11 = vmul.f32 %v459_v5, %v384_v7 }
 0x1cc   :  { %v386_v14 = vadd.f32 %v459_v5, %v385_v11 }
 0x1ce   :  { %v390_v16 = vsel %vm389_vm2, %v459_v5, %v386_v14 }
 0x1cf   :  { %v395_v17 = vsel %vm392_vm3, %v394_v15, %v390_v16 }
 0x1d0   :  { %v396_v18 = vmul.f32 %v457_v0, %v395_v17 }
 0x1d2   :  { %397 = vst [vmem:[#allocation10] sm:$0xff] %v396_v18 }
 0x1d3   :  { %408 = dma.vmem_to_hbm [thread:$0]  %s404_s15, 128, %s406_s18, [#allocation4]  }
 0x1d4   :  { %574 = dma.done.wait [#allocation4], 128  }
 0x1d5   :  { %575 = vsyncadd [#allocation4], 4294967168 }
 0x1d6   :  { %413 = vsyncpa [#allocation3], 1 }
 0x1d7   :  { %414 = vsyncpa [#allocation8], 1 }
 0x1d8   :  { %415 = vsyncpa [#allocation4], 1 }
 0x1d9   :  { %416 = vsyncpa [#allocation5], 1 }

</bundles_post_ra>
